<compile_context>
chip_gen: v5e
topology: v5e:2x2
jax: 0.10.0
libtpu: 0.0.40
codegen_flags: <defaults>
</compile_context>

<pallas_src>
import jax
import jax.numpy as jnp
from jax import lax
from jax.experimental import pallas as pl
from jax.experimental.pallas import tpu as pltpu


def _round_up(x: int, m: int) -> int:
    return ((x + m - 1) // m) * m


def critic_kernel(x_ref, w1t_ref, b1_ref, w2_ref, b2_ref, o_ref):
    """One row-tile of the critic MLP.

    x_ref  : (TM, E)  activation tile (rows on sublanes, features on lanes)
    w1t_ref: (H, E)   first Linear weight, (out, in) layout ; VMEM resident
    b1_ref : (H, 1)   first Linear bias (column)            ; VMEM resident
    w2_ref : (1, H)   second Linear weight (row)            ; VMEM resident
    b2_ref : (1,)     second Linear bias (scalar)           ; SMEM
    o_ref  : (1, TM)  lane-dense output row (one value per input row)
    """
    x = x_ref[...]
    # h_T[h, m] = sum_e W1[h, e] * x[m, e]   (MXU, q @ k^T contraction pattern)
    h = lax.dot_general(
        w1t_ref[...], x,
        dimension_numbers=(((1,), (1,)), ((), ())),
        preferred_element_type=jnp.float32,
    )                                                    # (H, TM)
    h = jnp.maximum(h + b1_ref[...], 0.0)                # bias + ReLU (VPU)
    # Second Linear (H -> 1) on the MXU: (1,H) @ (H,TM) -> (1,TM).
    v = lax.dot_general(
        w2_ref[...], h,
        dimension_numbers=(((1,), (0,)), ((), ())),
        preferred_element_type=jnp.float32,
    )                                                    # (1, TM)
    o_ref[...] = (v + b2_ref[0]).astype(o_ref.dtype)


def critic_forward(agent_embed, w1, b1, w2, b2, *, max_block_m: int = 16384):
    """agent_embed: [batch, num_agents, embed_dim] -> value: [batch, num_agents, 1].

    w1: [E, H], b1: [H], w2: [H, 1], b2: [1]  (math layout: x @ w1 + b1).
    """
    B, A, E = agent_embed.shape
    H = w1.shape[1]
    M = B * A

    x = agent_embed.reshape(M, E)

    # ---- adaptive row tiling (only M is worth tiling: E=32 / H=64 are tiny) --
    if M <= 1024:
        # Single tile; block shape equals the full array dims, so no (8,128)
        # alignment requirement and no padding at all.
        tm = M
    else:
        # >= ~4 grid steps (megacore + double-buffering), lane-aligned tile,
        # capped at a 2 MiB x tile (16384 * 32 * 4 B).
        tm = min(max_block_m, _round_up(pl.cdiv(M, 4), 128))
    grid_m = pl.cdiv(M, tm)          # ragged last tile handled by Pallas
    m_ceil = grid_m * tm             # rows actually touched by the kernel

    # Tiny parameter tensors, reshaped for the transposed formulation.
    w1t = jnp.transpose(w1)          # (H, E)
    b1c = b1.reshape(H, 1)           # (H, 1)
    w2r = w2.reshape(1, H)           # (1, H)
    b2s = b2.reshape(1)              # (1,)

    # ---- VMEM budget derived from the chosen tile --------------------------
    x_bytes = 2 * tm * E * 4                     # double-buffered x tile
    h_bytes = 2 * H * tm * 4                     # (H, TM) intermediate (+copy)
    out_bytes = 2 * tm * 4                       # double-buffered (1, TM) out
    param_bytes = (H * E + 2 * H + 8) * 4        # resident weights / biases
    vmem_needed = x_bytes + h_bytes + out_bytes + param_bytes
    vmem_limit = min(48 * 1024 * 1024,
                     max(32 * 1024 * 1024, int(vmem_needed * 3 // 2)))

    flops = 2 * m_ceil * E * H + 2 * m_ceil * H + 2 * m_ceil * H
    bytes_accessed = 4 * (m_ceil * E + H * E + 2 * H + 1 + m_ceil)

    out = pl.pallas_call(
        critic_kernel,
        out_shape=jax.ShapeDtypeStruct((1, M), jnp.float32),
        grid=(grid_m,),
        in_specs=[
            pl.BlockSpec((tm, E), lambda i: (i, 0)),            # x: row tiles
            pl.BlockSpec((H, E), lambda i: (0, 0)),             # W1^T resident
            pl.BlockSpec((H, 1), lambda i: (0, 0)),             # b1   resident
            pl.BlockSpec((1, H), lambda i: (0, 0)),             # w2   resident
            pl.BlockSpec(memory_space=pltpu.MemorySpace.SMEM),  # b2 scalar
        ],
        out_specs=pl.BlockSpec((1, tm), lambda i: (0, i)),
        compiler_params=pltpu.CompilerParams(
            dimension_semantics=("parallel",),                  # megacore split
            vmem_limit_bytes=vmem_limit,
        ),
        cost_estimate=pl.CostEstimate(
            flops=flops, transcendentals=0, bytes_accessed=bytes_accessed),
    )(x, w1t, b1c, w2r, b2s)

    return out[0, :M].reshape(B, A, 1)


def _reference(agent_embed, w1, b1, w2, b2):
    h = jnp.maximum(agent_embed @ w1 + b1, 0.0)
    return h @ w2 + b2


if __name__ == "__main__":
    embed_dim, hidden = 32, 64
    key = jax.random.PRNGKey(0)
    k_x1, k_x2, k_w1, k_b1, k_w2, k_b2 = jax.random.split(key, 6)

    # Deterministic parameter init (synthetic; mimics nn.Linear weight scale).
    w1 = jax.random.uniform(k_w1, (embed_dim, hidden), jnp.float32,
                            -1.0 / embed_dim ** 0.5, 1.0 / embed_dim ** 0.5)
    b1 = jax.random.uniform(k_b1, (hidden,), jnp.float32,
                            -1.0 / embed_dim ** 0.5, 1.0 / embed_dim ** 0.5)
    w2 = jax.random.uniform(k_w2, (hidden, 1), jnp.float32,
                            -1.0 / hidden ** 0.5, 1.0 / hidden ** 0.5)
    b2 = jax.random.uniform(k_b2, (1,), jnp.float32,
                            -1.0 / hidden ** 0.5, 1.0 / hidden ** 0.5)

    # Case 1: small, single full-size tile (batch=2, num_agents=8 -> M=16).
    x_small = jax.random.normal(k_x1, (2, 8, embed_dim), jnp.float32)
    v_small = jax.block_until_ready(critic_forward(x_small, w1, b1, w2, b2))
    assert v_small.shape == (2, 8, 1)
    assert jnp.allclose(v_small, _reference(x_small, w1, b1, w2, b2),
                        atol=1e-5, rtol=1e-5)

    # Case 2: multi-tile grid with a ragged last tile and NO wrapper padding
    # (batch=4, num_agents=300 -> M=1200, tm=384 -> grid=(4,), last tile ragged).
    x_big = jax.random.normal(k_x2, (4, 300, embed_dim), jnp.float32)
    v_big = jax.block_until_ready(critic_forward(x_big, w1, b1, w2, b2))
    assert v_big.shape == (4, 300, 1)
    assert jnp.allclose(v_big, _reference(x_big, w1, b1, w2, b2),
                        atol=1e-5, rtol=1e-5)

    print("KERNEL_OK")
</pallas_src>

<mosaic_0001>
module attributes {stable_mosaic.version = 11 : i64} {
  func.func @critic_kernel(%arg0: i32, %arg1: memref<16x32xf32, #tpu.memory_space<vmem>>, %arg2: memref<64x32xf32, #tpu.memory_space<vmem>>, %arg3: memref<64x1xf32, #tpu.memory_space<vmem>>, %arg4: memref<1x64xf32, #tpu.memory_space<vmem>>, %arg5: memref<1xf32, #tpu.memory_space<smem>>, %arg6: memref<1x16xf32, #tpu.memory_space<vmem>>) attributes {dimension_semantics = [#tpu.dimension_semantics<parallel>], iteration_bounds = array<i64: 1>, scalar_prefetch = 0 : i64, scratch_operands = 0 : i64, tpu.core_type = #tpu.core_type<tc>, window_params = [{transform_indices = @transform_0, window_bounds = array<i64: 16, 32>}, {pipeline_mode = #tpu.pipeline_mode<synchronous>, transform_indices = @transform_1, window_bounds = array<i64: 64, 32>}, {pipeline_mode = #tpu.pipeline_mode<synchronous>, transform_indices = @transform_2, window_bounds = array<i64: 64, 1>}, {pipeline_mode = #tpu.pipeline_mode<synchronous>, transform_indices = @transform_3, window_bounds = array<i64: 1, 64>}, {transform_indices = @transform_4, window_bounds = array<i64: 1>}, {transform_indices = @transform_5, window_bounds = array<i64: 1, 16>}]} {
    %c0 = arith.constant 0 : index
    %c0_0 = arith.constant 0 : index
    %0 = vector.load %arg1[%c0, %c0_0] : memref<16x32xf32, #tpu.memory_space<vmem>>, vector<16x32xf32>
    %c0_1 = arith.constant 0 : index
    %c0_2 = arith.constant 0 : index
    %1 = vector.load %arg2[%c0_1, %c0_2] : memref<64x32xf32, #tpu.memory_space<vmem>>, vector<64x32xf32>
    %cst = arith.constant dense<0.000000e+00> : vector<64x16xf32>
    %2 = tpu.matmul %1, %0, %cst {dimension_numbers = #tpu.dot_dimension_numbers<[1], [1], [0], [0], [0, 0, 1, 0], [], []>} : vector<64x32xf32>, vector<16x32xf32>, vector<64x16xf32> -> vector<64x16xf32>
    %c0_3 = arith.constant 0 : index
    %c0_4 = arith.constant 0 : index
    %3 = vector.load %arg3[%c0_3, %c0_4] : memref<64x1xf32, #tpu.memory_space<vmem>>, vector<64x1xf32>
    %4 = vector.broadcast %3 : vector<64x1xf32> to vector<64x16xf32>
    %5 = arith.addf %2, %4 : vector<64x16xf32>
    %cst_5 = arith.constant 0.000000e+00 : f32
    %6 = vector.broadcast %cst_5 : f32 to vector<64x16xf32>
    %7 = arith.maximumf %5, %6 : vector<64x16xf32>
    %c0_6 = arith.constant 0 : index
    %c0_7 = arith.constant 0 : index
    %8 = vector.load %arg4[%c0_6, %c0_7] : memref<1x64xf32, #tpu.memory_space<vmem>>, vector<1x64xf32>
    %cst_8 = arith.constant dense<0.000000e+00> : vector<1x16xf32>
    %9 = tpu.matmul %8, %7, %cst_8 {dimension_numbers = #tpu.dot_dimension_numbers<[1], [0], [0], [1], [0, 0, 1, 1], [], []>} : vector<1x64xf32>, vector<64x16xf32>, vector<1x16xf32> -> vector<1x16xf32>
    %c0_9 = arith.constant 0 : index
    %10 = memref.load %arg5[%c0_9] : memref<1xf32, #tpu.memory_space<smem>>
    %11 = vector.broadcast %10 : f32 to vector<1x16xf32>
    %12 = arith.addf %9, %11 : vector<1x16xf32>
    %c0_10 = arith.constant 0 : index
    %c0_11 = arith.constant 0 : index
    %13 = vector.load %arg6[%c0_10, %c0_11] : memref<1x16xf32, #tpu.memory_space<vmem>>, vector<1x16xf32>
    tpu.vector_store %arg6[%c0_10, %c0_11], %12 {strides = array<i32>} : memref<1x16xf32, #tpu.memory_space<vmem>>, vector<1x16xf32>,
    return
  }
  func.func @transform_0(%arg0: i32) -> (i32, i32) {
    %c0_i32 = arith.constant 0 : i32
    %c0_i32_0 = arith.constant 0 : i32
    return %arg0, %c0_i32 : i32, i32
  }
  func.func @transform_1(%arg0: i32) -> (i32, i32) {
    %c0_i32 = arith.constant 0 : i32
    %c0_i32_0 = arith.constant 0 : i32
    %c0_i32_1 = arith.constant 0 : i32
    return %c0_i32, %c0_i32_0 : i32, i32
  }
  func.func @transform_2(%arg0: i32) -> (i32, i32) {
    %c0_i32 = arith.constant 0 : i32
    %c0_i32_0 = arith.constant 0 : i32
    %c0_i32_1 = arith.constant 0 : i32
    return %c0_i32, %c0_i32_0 : i32, i32
  }
  func.func @transform_3(%arg0: i32) -> (i32, i32) {
    %c0_i32 = arith.constant 0 : i32
    %c0_i32_0 = arith.constant 0 : i32
    %c0_i32_1 = arith.constant 0 : i32
    return %c0_i32, %c0_i32_0 : i32, i32
  }
  func.func @transform_4(%arg0: i32) -> i32 {
    %c0_i32 = arith.constant 0 : i32
    %c0_i32_0 = arith.constant 0 : i32
    return %c0_i32 : i32
  }
  func.func @transform_5(%arg0: i32) -> (i32, i32) {
    %c0_i32 = arith.constant 0 : i32
    %c0_i32_0 = arith.constant 0 : i32
    return %c0_i32, %arg0 : i32, i32
  }
}

</mosaic_0001>

<bundles_post_ra>
// kernel: tpu_custom_call.1
= control target key start
LH: loop header
LB: loop body
LE: loop exit
PB: predicated region body
PF: predicated region fallthrough
CT: control target
= control target key end

     0   :  { %vm80_vm0 = vcmask 261120   ;;  %v251_v3 = vmov 0   ;;  %s360_s0 = inlined_call_operand.vmem [shape: f32[16,32], index: 0, kind: input, shape index: {}]   ;;  %s361_s1 = inlined_call_operand.vmem [shape: f32[64,32], index: 1, kind: input, shape index: {}]   ;;  %s362_s2 = inlined_call_operand.vmem [shape: f32[64,1], index: 2, kind: input, shape index: {}]   ;;  %s363_s3 = inlined_call_operand.vmem [shape: f32[1,64], index: 3, kind: input, shape index: {}]   ;;  %s364_s4 = inlined_call_operand.<no memory space> [shape: f32[1], index: 4, kind: input, shape index: {}]   ;;  %s365_s5 = inlined_call_operand.hbm [shape: f32[1,16], index: 5, kind: output, shape index: {}]  }
   0x1   :  { %v23_v0 = vld [vmem:[%s360_s0 + $0x8] sm:$0xff]  ;;  %v39_v1 = vld [vmem:[%s362_s2 + $0x38] sm:$0xff]  ;;  %v22_v2 = vld [vmem:[%s360_s0] sm:$0xff]  ;;  %223 = vset.pattern.permute.xlu1 %v251_v3  ;;  %222 = vset.pattern.permute.xlu0 %v251_v3 }
   0x2   :  { %216 = vmatpush.xpose.msk.msra.mxu2 %vm80_vm0, %v23_v0  ;;  %217 = vmatpush.xpose.msk.msra.mxu3 %vm80_vm0, %v23_v0  ;;  %v37_v4 = vld [vmem:[%s362_s2 + $0x28] sm:$0xff]  ;;  %v27_v5 = vld [vmem:[%s361_s1 + $0x18] sm:$0xff]  ;;  %v30_v6 = vld [vmem:[%s361_s1 + $0x30] sm:$0xff] }
   0x3   :  { %205 = vmatpush.xpose.msk.msra.mxu0 %vm80_vm0, %v23_v0  ;;  %67 = vperm.xlu1 %223, %v37_v4   ;;  %v35_v7 = vld [vmem:[%s362_s2 + $0x18] sm:$0xff]  ;;  %v24_v8 = vld [vmem:[%s361_s1] sm:$0xff] }
   0x4   :  { %77 = vperm.xlu0 %222, %v39_v1   ;;  %224 = vset.pattern.permute.xlu2 %v251_v3 }
   0x5   :  { %57 = vperm.xlu2 %224, %v35_v7  }
   0x6   :  { %218 = vmatpush.xpose.msk.msra.mxu2 %vm80_vm0, %v22_v2  ;;  %219 = vmatpush.xpose.msk.msra.mxu3 %vm80_vm0, %v22_v2 }
   0x7   :  { %206 = vmatpush.xpose.msk.msra.mxu0 %vm80_vm0, %v22_v2 }
   0x8   :  { %11 = vsyncpa [#allocation4], 0  ;;  %v36_v9 = vld [vmem:[%s362_s2 + $0x20] sm:$0xff]  ;;  %v38_v10 = vld [vmem:[%s362_s2 + $0x30] sm:$0xff]  ;;  %vm163_vm1 = vcmask 523264   ;;  %v162_v52 = vstv %s364_s4  ;;  %s252_s29 = smov [#allocation3]  }
   0x9   :  { %210 = vmatmul.msk.f32.vlgmr.msra.gmra.mxu2 %vm80_vm0, %v27_v5  ;;  %213 = vmatmul.msk.f32.vlgmr.msra.gmra.mxu3 %vm80_vm0, %v30_v6  ;;  %v34_v11 = vld [vmem:[%s362_s2 + $0x10] sm:$0xff]  ;;  %v28_v12 = vld [vmem:[%s361_s1 + $0x20] sm:$0xff]  ;;  %v31_v13 = vld [vmem:[%s361_s1 + $0x38] sm:$0xff]  ;;  %s194_s30 = sshll.u32 %s252_s29, 4  ;;  %s196_s8 = sshll.u32 %s365_s5, 4  ;;  %vm187_vm2 = vcmask 122880   ;;  %s195_s30 = int_to_ptr.vmem [resolvable:$true] %s194_s30  ;;  %s197_s8 = int_to_ptr.hbm [resolvable:$true] %s196_s8 }
   0xa   :  { %207 = vmatmul.msk.f32.vlgmr.msra.gmra.mxu0 %vm80_vm0, %v24_v8  ;;  %v25_v14 = vld [vmem:[%s361_s1 + $0x8] sm:$0xff]  ;;  %v32_v15 = vld [vmem:[%s362_s2] sm:$0xff]  ;;  %v26_v18 = vld [vmem:[%s361_s1 + $0x10] sm:$0xff] }
   0xb   :  { %62 = vperm.xlu1 %223, %v36_v9   ;;  %v33_v16 = vld [vmem:[%s362_s2 + $0x8] sm:$0xff]  ;;  %v160_v51 = vld [vmem:[%s363_s3] sm:$0x1] }
   0xc   :  { %72 = vperm.xlu0 %222, %v38_v10   ;;  %v29_v17 = vld [vmem:[%s361_s1 + $0x28] sm:$0xff] }
   0xd   :  { %52 = vperm.xlu2 %224, %v34_v11  }
  0x11   :  { %211 = vmatmul.msk.f32.gmra.mxu2 %vm80_vm0, %v28_v12  ;;  %214 = vmatmul.msk.f32.gmra.mxu3 %vm80_vm0, %v31_v13 }
  0x12   :  { %208 = vmatmul.msk.f32.gmra.mxu0 %vm80_vm0, %v25_v14 }
  0x13   :  { %42 = vperm.xlu1 %223, %v32_v15  }
  0x14   :  { %47 = vperm.xlu0 %222, %v33_v16  }
  0x19   :  { %212 = vmatmul.msk.f32.gmra.mxu2 %vm80_vm0, %v29_v17 }
  0x1a   :  { %209 = vmatmul.msk.f32.gmra.mxu0 %vm80_vm0, %v26_v18 }
  0x5f   :  { %v58_v30 = vpop.permute.xlu2 %57 }
  0x67   :  { %v53_v37 = vpop.permute.xlu2 %52 }
  0x75   :  { %v68_v23 = vpop.permute.xlu1 %67 }
  0x76   :  { %v78_v19 = vpop.permute.xlu0 %77 }
  0x7d   :  { %v63_v32 = vpop.permute.xlu1 %62 }
  0x7e   :  { %v73_v24 = vpop.permute.xlu0 %72 }
  0x85   :  { %v43_v44 = vpop.permute.xlu1 %42 }
  0x86   :  { %v48_v41 = vpop.permute.xlu0 %47 }
  0x87   :  { %v128_v20 = vpop.f32.mrf.mxu0 }
  0x88   :  { %v129_v47 = vadd.f32 %v128_v20, %v43_v44 }
  0x8a   :  { %v152_v50 = vmax.f32 %v129_v47, 0.0 }
  0x8c   :  { %v137_v21 = vpop.f32.mrf.mxu2  ;;  %v146_v22 = vpop.f32.mrf.mxu3 }
  0x8d   :  { %v147_v28 = vadd.f32 %v146_v22, %v73_v24  ;;  %v138_v39 = vadd.f32 %v137_v21, %v58_v30 }
  0x8f   :  { %v131_v25 = vpop.f32.mrf.mxu0  ;;  %v158_v33 = vmax.f32 %v147_v28, 0.0  ;;  %v155_v45 = vmax.f32 %v138_v39, 0.0 }
  0x90   :  { %v132_v46 = vadd.f32 %v131_v25, %v48_v41 }
  0x92   :  { %v153_v49 = vmax.f32 %v132_v46, 0.0 }
  0x94   :  { %v140_v26 = vpop.f32.mrf.mxu2  ;;  %v149_v27 = vpop.f32.mrf.mxu3 }
  0x95   :  { %v150_v29 = vadd.f32 %v149_v27, %v78_v19  ;;  %v141_v35 = vadd.f32 %v140_v26, %v63_v32 }
  0x97   :  { %v159_v31 = vmax.f32 %v150_v29, 0.0  ;;  %v134_v38 = vpop.f32.mrf.mxu0  ;;  %v156_v42 = vmax.f32 %v141_v35, 0.0 }
  0x98   :  { %v135_v43 = vadd.f32 %v134_v38, %v53_v37 }
  0x99   :  { %175 = vmatpush.msra.mxu1 %v159_v31 }
  0x9a   :  { %v154_v48 = vmax.f32 %v135_v43, 0.0 }
  0x9b   :  { %176 = vmatpush.msra.mxu1 %v158_v33 }
  0x9c   :  { %v143_v34 = vpop.f32.mrf.mxu2 }
  0x9d   :  { %v144_v36 = vadd.f32 %v143_v34, %v68_v23 }
  0x9f   :  { %v157_v40 = vmax.f32 %v144_v36, 0.0 }
  0xa1   :  { %177 = vmatpush.msra.mxu1 %v157_v40 }
  0xa3   :  { %178 = vmatpush.msra.mxu1 %v156_v42 }
  0xa5   :  { %179 = vmatpush.msra.mxu1 %v155_v45 }
  0xa7   :  { %180 = vmatpush.msra.mxu1 %v154_v48 }
  0xa9   :  { %181 = vmatpush.msra.mxu1 %v153_v49 }
  0xab   :  { %182 = vmatpush.msra.mxu1 %v152_v50 }
  0xac   :  { %215 = vmatmul.msk.f32.vlgmr.msra.gmra.mxu1 %vm163_vm1, %v160_v51 }
 0x129   :  { %v184_v53 = vpop.f32.mrf.mxu1 }
 0x12a   :  { %v185_v54 = vadd.f32 %v184_v53, %v162_v52 }
 0x12c   :  { %188 = vst.msk [vmem:[#allocation3] sm:$0x1] %vm187_vm2, %v185_v54 }
 0x12d   :  { %199 = dma.vmem_to_hbm [thread:$0]  %s195_s30, 16, %s197_s8, [#allocation4]  }
 0x12e   :  { %249 = dma.done.wait [#allocation4], 16  }
 0x12f   :  { %250 = vsyncadd [#allocation4], 4294967280 }
 0x130   :  { %204 = vsyncpa [#allocation4], 1 }

</bundles_post_ra>
